<compile_context>
chip_gen: v7x
topology: tpu7x:2x2x1
jax: 0.10.0
libtpu: 0.0.40
codegen_flags: <defaults>
</compile_context>

<pallas_src>
import functools

import jax
import jax.numpy as jnp
from jax.experimental import pallas as pl
from jax.experimental.pallas import tpu as pltpu

LANES = 128  # weights / hidden / output are padded to the 128-lane register width


def _round_up(n, m):
    return -(-n // m) * m


def actor_critic_kernel(x_ref, p_ref, out_ref, *, state_size, action_size):
    S, A = state_size, action_size

    x = x_ref[...]                                    # (TILE_B, S) true-width input

    # static, sublane-aligned views into the packed parameter slab
    w1 = p_ref[0:S, :]                                # (S, 128)   only live input rows
    w2 = p_ref[128:256, :]                            # (128, 128)
    wh = p_ref[256:384, :]                            # (128, 128) fused actor|critic head
    b1 = p_ref[384:385, :]                            # direct (1,128) row loads
    b2 = p_ref[385:386, :]
    bh = p_ref[386:387, :]

    # base MLP: Linear + ReLU, Linear + ReLU (padded lanes stay exactly zero)
    h1 = jnp.maximum(jnp.dot(x, w1, preferred_element_type=jnp.float32) + b1, 0.0)
    h2 = jnp.maximum(jnp.dot(h1, w2, preferred_element_type=jnp.float32) + b2, 0.0)

    # fused heads: lanes 0..A-1 = actor logits, lane A = critic value
    head = jnp.dot(h2, wh, preferred_element_type=jnp.float32) + bh  # (TILE_B, 128)

    lane = jax.lax.broadcasted_iota(jnp.int32, head.shape, 1)
    is_actor = lane < A

    # numerically-stable softmax over the actor lanes only
    masked = jnp.where(is_actor, head, -jnp.inf)
    m = jnp.max(masked, axis=-1, keepdims=True)
    e = jnp.exp(masked - m)                           # padded lanes -> exp(-inf) = 0
    denom = jnp.sum(e, axis=-1, keepdims=True)
    r = pl.reciprocal(denom, approx=True)             # EUP vrcp
    r = r * (2.0 - denom * r)                         # one Newton step -> ~f32 exact
    probs = e * r

    # lane-dense output slab: probs in lanes 0..A-1, raw critic value in lane A
    out_ref[...] = jnp.where(lane == A, head, probs)


def pack_params(params):
    """Pack all weights/biases into one lane-dense (392, 128) f32 slab."""
    def pad2(a, rows):
        return jnp.pad(a.astype(jnp.float32),
                       ((0, rows - a.shape[0]), (0, LANES - a.shape[1])))

    w1 = pad2(params["w1"], LANES)                                   # (128, 128)
    w2 = pad2(params["w2"], LANES)                                   # (128, 128)
    wh = pad2(jnp.concatenate([params["wa"], params["wc"]], axis=1), LANES)
    b1 = pad2(params["b1"], 1)
    b2 = pad2(params["b2"], 1)
    bh = pad2(jnp.concatenate([params["ba"], params["bc"]], axis=1), 1)
    bias_block = jnp.concatenate(
        [b1, b2, bh, jnp.zeros((5, LANES), jnp.float32)], axis=0)    # (8, 128)
    return jnp.concatenate([w1, w2, wh, bias_block], axis=0)         # (392, 128)


def actor_critic_forward(x, params):
    """x: (B, state_size) f32. Returns (action_probs (B,A), state_value (B,1))."""
    B, S = x.shape
    H = params["w1"].shape[1]
    A = params["wa"].shape[1]
    assert S <= LANES and H <= LANES and A + 1 <= LANES

    slab = pack_params(params)
    p_rows = slab.shape[0]

    # Batch tiling: up to 1024 rows per step to amortize per-step overhead,
    # but never more than ceil(B/2) (rounded up to a sublane multiple) so the
    # grid has >=2 steps for large batches and both v7x TensorCores get work.
    tile_b = max(8, min(1024, _round_up(-(-B // 2), 8)))
    b_pad = _round_up(B, tile_b)
    grid_steps = b_pad // tile_b

    # Pad only the batch dimension (no lane-padded copy of x).
    x_p = x.astype(jnp.float32)
    if b_pad != B:
        x_p = jnp.pad(x_p, ((0, b_pad - B), (0, 0)))

    kernel = functools.partial(actor_critic_kernel, state_size=S, action_size=A)

    cost = pl.CostEstimate(
        flops=3 * 2 * b_pad * LANES * LANES,
        transcendentals=b_pad * LANES,
        bytes_accessed=4 * (b_pad * S + grid_steps * p_rows * LANES + b_pad * LANES),
    )

    out = pl.pallas_call(
        kernel,
        out_shape=jax.ShapeDtypeStruct((b_pad, LANES), jnp.float32),
        grid_spec=pltpu.PrefetchScalarGridSpec(
            num_scalar_prefetch=0,
            grid=(grid_steps,),
            in_specs=[
                # x tile: last dim equals the full array dim (S), so no 128-lane pad
                pl.BlockSpec((tile_b, S), lambda i: (i, 0)),
                # params: same block every step -> stays VMEM-resident
                pl.BlockSpec((p_rows, LANES), lambda i: (0, 0)),
            ],
            out_specs=pl.BlockSpec((tile_b, LANES), lambda i: (i, 0)),
        ),
        compiler_params=pltpu.CompilerParams(
            dimension_semantics=("parallel",)),
        cost_estimate=cost,
    )(x_p, slab)

    probs = out[:B, :A]
    value = out[:B, A:A + 1]
    return probs, value


def init_params(key, state_size, action_size, hidden_size=64):
    """Deterministic init mirroring nn.Linear default, weights stored (in, out)."""
    def linear(k, fan_in, fan_out):
        kw, kb = jax.random.split(k)
        bound = 1.0 / jnp.sqrt(jnp.float32(fan_in))
        w = jax.random.uniform(kw, (fan_in, fan_out), jnp.float32, -bound, bound)
        b = jax.random.uniform(kb, (1, fan_out), jnp.float32, -bound, bound)
        return w, b

    k1, k2, k3, k4 = jax.random.split(key, 4)
    w1, b1 = linear(k1, state_size, hidden_size)
    w2, b2 = linear(k2, hidden_size, hidden_size)
    wa, ba = linear(k3, hidden_size, action_size)
    wc, bc = linear(k4, hidden_size, 1)
    return dict(w1=w1, b1=b1, w2=w2, b2=b2, wa=wa, ba=ba, wc=wc, bc=bc)


def reference_forward(x, p):
    """Pure-JAX reference for correctness check."""
    h1 = jnp.maximum(x @ p["w1"] + p["b1"], 0.0)
    h2 = jnp.maximum(h1 @ p["w2"] + p["b2"], 0.0)
    logits = h2 @ p["wa"] + p["ba"]
    probs = jax.nn.softmax(logits, axis=-1)
    value = h2 @ p["wc"] + p["bc"]
    return probs, value


if __name__ == "__main__":
    state_size, action_size, hidden_size = 8, 4, 64
    batch = 2

    key = jax.random.PRNGKey(0)
    k_params, k_x = jax.random.split(key)

    params = init_params(k_params, state_size, action_size, hidden_size)
    x = jax.random.normal(k_x, (batch, state_size), dtype=jnp.float32)

    probs, value = actor_critic_forward(x, params)
    jax.block_until_ready((probs, value))

    ref_probs, ref_value = reference_forward(x, params)
    assert probs.shape == (batch, action_size)
    assert value.shape == (batch, 1)
    assert jnp.allclose(probs, ref_probs, atol=1e-5, rtol=1e-5)
    assert jnp.allclose(value, ref_value, atol=1e-5, rtol=1e-5)
    assert jnp.allclose(jnp.sum(probs, axis=-1), 1.0, atol=1e-5)

    print("KERNEL_OK")
</pallas_src>

<mosaic_0001>
module attributes {stable_mosaic.version = 11 : i64} {
  func.func @actor_critic_kernel(%arg0: i32, %arg1: memref<8x8xf32, #tpu.memory_space<vmem>>, %arg2: memref<392x128xf32, #tpu.memory_space<vmem>>, %arg3: memref<8x128xf32, #tpu.memory_space<vmem>>) attributes {dimension_semantics = [#tpu.dimension_semantics<parallel>], iteration_bounds = array<i64: 1>, scalar_prefetch = 0 : i64, scratch_operands = 0 : i64, tpu.core_type = #tpu.core_type<tc>, window_params = [{transform_indices = @transform_0, window_bounds = array<i64: 8, 8>}, {pipeline_mode = #tpu.pipeline_mode<synchronous>, transform_indices = @transform_1, window_bounds = array<i64: 392, 128>}, {transform_indices = @transform_2, window_bounds = array<i64: 8, 128>}]} {
    %c0 = arith.constant 0 : index
    %c0_0 = arith.constant 0 : index
    %0 = vector.load %arg1[%c0, %c0_0] : memref<8x8xf32, #tpu.memory_space<vmem>>, vector<8x8xf32>
    %c0_1 = arith.constant 0 : index
    %c0_2 = arith.constant 0 : index
    %1 = vector.load %arg2[%c0_1, %c0_2] : memref<392x128xf32, #tpu.memory_space<vmem>>, vector<8x128xf32>
    %c128 = arith.constant 128 : index
    %c0_3 = arith.constant 0 : index
    %2 = vector.load %arg2[%c128, %c0_3] : memref<392x128xf32, #tpu.memory_space<vmem>>, vector<128x128xf32>
    %c256 = arith.constant 256 : index
    %c0_4 = arith.constant 0 : index
    %3 = vector.load %arg2[%c256, %c0_4] : memref<392x128xf32, #tpu.memory_space<vmem>>, vector<128x128xf32>
    %c384 = arith.constant 384 : index
    %c0_5 = arith.constant 0 : index
    %4 = vector.load %arg2[%c384, %c0_5] : memref<392x128xf32, #tpu.memory_space<vmem>>, vector<1x128xf32>
    %c385 = arith.constant 385 : index
    %c0_6 = arith.constant 0 : index
    %5 = vector.load %arg2[%c385, %c0_6] : memref<392x128xf32, #tpu.memory_space<vmem>>, vector<1x128xf32>
    %c386 = arith.constant 386 : index
    %c0_7 = arith.constant 0 : index
    %6 = vector.load %arg2[%c386, %c0_7] : memref<392x128xf32, #tpu.memory_space<vmem>>, vector<1x128xf32>
    %cst = arith.constant dense<0.000000e+00> : vector<8x128xf32>
    %7 = tpu.matmul %0, %1, %cst {dimension_numbers = #tpu.dot_dimension_numbers<[1], [0], [0], [1], [0, 0, 1, 1], [], []>} : vector<8x8xf32>, vector<8x128xf32>, vector<8x128xf32> -> vector<8x128xf32>
    %8 = vector.broadcast %4 : vector<1x128xf32> to vector<8x128xf32>
    %9 = arith.addf %7, %8 : vector<8x128xf32>
    %cst_8 = arith.constant 0.000000e+00 : f32
    %10 = vector.broadcast %cst_8 : f32 to vector<8x128xf32>
    %11 = arith.maximumf %9, %10 : vector<8x128xf32>
    %cst_9 = arith.constant dense<0.000000e+00> : vector<8x128xf32>
    %12 = tpu.matmul %11, %2, %cst_9 {dimension_numbers = #tpu.dot_dimension_numbers<[1], [0], [0], [1], [0, 0, 1, 1], [], []>} : vector<8x128xf32>, vector<128x128xf32>, vector<8x128xf32> -> vector<8x128xf32>
    %13 = vector.broadcast %5 : vector<1x128xf32> to vector<8x128xf32>
    %14 = arith.addf %12, %13 : vector<8x128xf32>
    %cst_10 = arith.constant 0.000000e+00 : f32
    %15 = vector.broadcast %cst_10 : f32 to vector<8x128xf32>
    %16 = arith.maximumf %14, %15 : vector<8x128xf32>
    %cst_11 = arith.constant dense<0.000000e+00> : vector<8x128xf32>
    %17 = tpu.matmul %16, %3, %cst_11 {dimension_numbers = #tpu.dot_dimension_numbers<[1], [0], [0], [1], [0, 0, 1, 1], [], []>} : vector<8x128xf32>, vector<128x128xf32>, vector<8x128xf32> -> vector<8x128xf32>
    %18 = vector.broadcast %6 : vector<1x128xf32> to vector<8x128xf32>
    %19 = arith.addf %17, %18 : vector<8x128xf32>
    %20 = tpu.iota {dimensions = array<i32: 1>} : vector<8x128xi32>
    %c4_i32 = arith.constant 4 : i32
    %21 = vector.broadcast %c4_i32 : i32 to vector<8x128xi32>
    %22 = arith.cmpi slt, %20, %21 : vector<8x128xi32>
    %cst_12 = arith.constant 0xFF800000 : f32
    %23 = vector.broadcast %cst_12 : f32 to vector<8x128xf32>
    %24 = arith.select %22, %19, %23 : vector<8x128xi1>, vector<8x128xf32>
    %cst_13 = arith.constant dense<0xFF800000> : vector<8xf32>
    %25 = vector.multi_reduction <maximumf>, %24, %cst_13 [1] : vector<8x128xf32> to vector<8xf32>
    %26 = vector.shape_cast %25 : vector<8xf32> to vector<8x1xf32>
    %27 = vector.broadcast %26 : vector<8x1xf32> to vector<8x128xf32>
    %28 = arith.subf %24, %27 : vector<8x128xf32>
    %29 = math.exp %28 : vector<8x128xf32>
    %cst_14 = arith.constant dense<0.000000e+00> : vector<8xf32>
    %30 = vector.multi_reduction <add>, %29, %cst_14 [1] : vector<8x128xf32> to vector<8xf32>
    %31 = vector.shape_cast %30 : vector<8xf32> to vector<8x1xf32>
    %32 = tpu.reciprocal %31 {approx = true} : vector<8x1xf32> -> vector<8x1xf32>
    %33 = arith.mulf %31, %32 : vector<8x1xf32>
    %cst_15 = arith.constant 2.000000e+00 : f32
    %34 = vector.broadcast %cst_15 : f32 to vector<8x1xf32>
    %35 = arith.subf %34, %33 : vector<8x1xf32>
    %36 = arith.mulf %32, %35 : vector<8x1xf32>
    %37 = vector.broadcast %36 : vector<8x1xf32> to vector<8x128xf32>
    %38 = arith.mulf %29, %37 : vector<8x128xf32>
    %c4_i32_16 = arith.constant 4 : i32
    %39 = vector.broadcast %c4_i32_16 : i32 to vector<8x128xi32>
    %40 = arith.cmpi eq, %20, %39 : vector<8x128xi32>
    %41 = arith.select %40, %19, %38 : vector<8x128xi1>, vector<8x128xf32>
    %c0_17 = arith.constant 0 : index
    %c0_18 = arith.constant 0 : index
    %42 = vector.load %arg3[%c0_17, %c0_18] : memref<8x128xf32, #tpu.memory_space<vmem>>, vector<8x128xf32>
    tpu.vector_store %arg3[%c0_17, %c0_18], %41 {strides = array<i32>} : memref<8x128xf32, #tpu.memory_space<vmem>>, vector<8x128xf32>,
    return
  }
  func.func @transform_0(%arg0: i32) -> (i32, i32) {
    %c0_i32 = arith.constant 0 : i32
    %c0_i32_0 = arith.constant 0 : i32
    return %arg0, %c0_i32 : i32, i32
  }
  func.func @transform_1(%arg0: i32) -> (i32, i32) {
    %c0_i32 = arith.constant 0 : i32
    %c0_i32_0 = arith.constant 0 : i32
    %c0_i32_1 = arith.constant 0 : i32
    return %c0_i32, %c0_i32_0 : i32, i32
  }
  func.func @transform_2(%arg0: i32) -> (i32, i32) {
    %c0_i32 = arith.constant 0 : i32
    %c0_i32_0 = arith.constant 0 : i32
    return %arg0, %c0_i32 : i32, i32
  }
}

</mosaic_0001>

<bundles_post_ra>
// kernel: tpu_custom_call.1
= control target key start
LH: loop header
LB: loop body
LE: loop exit
PB: predicated region body
PF: predicated region fallthrough
CT: control target
= control target key end

     0   :  { %7 = vsyncpa [#allocation3], 0  ;;  %s670_s0 = inlined_call_operand.hbm [shape: f32[8,8], index: 0, kind: input, shape index: {}]   ;;  %s671_s1 = inlined_call_operand.hbm [shape: f32[392,128], index: 1, kind: input, shape index: {}]   ;;  %s672_s2 = inlined_call_operand.hbm [shape: f32[8,128], index: 2, kind: output, shape index: {}]  }
   0x1   :  { %8 = vsyncpa [#allocation6], 0 }
   0x2   :  { %9 = vsyncpa [#allocation4], 0  ;;  %s585_s9 = smov [#allocation2]   ;;  %s586_s11 = smov [#allocation5]  }
   0x3   :  { %s16_s10 = sshll.u32 %s585_s9, 4  ;;  %s25_s12 = sshll.u32 %s586_s11, 4  ;;  %s17_s10 = int_to_ptr.vmem [resolvable:$true] %s16_s10  ;;  %s608_s12 = int_to_ptr.vmem [resolvable:$true] %s25_s12 }
   0x4   :  { %s513_s15 = scalar_lea.hbm %s670_s0, 128 }
   0x5   :  { %p514_p0 = scmp.ne.s32.totalorder %s670_s0, %s513_s15  ;;  %p517_p1 = scmp.lt.u32.totalorder %s513_s15, %s670_s0 }
   0x7   :  { %p519_p2 = pnand %p517_p1, %p514_p0 }
   0x9   :  { %522 = shalt.err (!%p519_p2)
}
   0xa   :  { %s523_s20 = scalar_lea.vmem %s17_s10, 128  ;;  %p528_p4 = scmp.lt.s32.totalorder %s17_s10, %s17_s10 }
   0xb   :  { %p524_p3 = scmp.ne.s32.totalorder %s17_s10, %s523_s20  ;;  %p529_p5 = scmp.lt.s32.totalorder %s523_s20, %s523_s20 }
   0xd   :  { %p530_p6 = por %p529_p5, %p528_p4 }
   0xf   :  { %p531_p7 = pnand %p530_p6, %p524_p3 }
  0x11   :  { %534 = shalt.err (!%p531_p7)
}
  0x12   :  { %19 = dma.hbm_to_vmem [thread:$0]  %s670_s0, 128, %s17_s10, [#allocation3]  }
  0x13   :  { %s535_s25 = scalar_lea.hbm %s671_s1, 6272 }
  0x14   :  { %p536_p8 = scmp.ne.s32.totalorder %s671_s1, %s535_s25  ;;  %p539_p9 = scmp.lt.u32.totalorder %s535_s25, %s671_s1 }
  0x16   :  { %p541_p10 = pnand %p539_p9, %p536_p8 }
  0x18   :  { %544 = shalt.err (!%p541_p10)
}
  0x19   :  { %s545_s30 = scalar_lea.vmem %s608_s12, 6272  ;;  %p550_p12 = scmp.lt.s32.totalorder %s608_s12, %s608_s12 }
  0x1a   :  { %p546_p11 = scmp.ne.s32.totalorder %s608_s12, %s545_s30  ;;  %p551_p13 = scmp.lt.s32.totalorder %s545_s30, %s545_s30 }
  0x1c   :  { %p552_p0 = por %p551_p13, %p550_p12 }
  0x1e   :  { %p553_p1 = pnand %p552_p0, %p546_p11 }
  0x20   :  { %556 = shalt.err (!%p553_p1)
}
  0x21   :  { %s587_s0 = smov 128   ;;  %s588_s3 = smov 8  }
  0x22   :  { %31 = dma.hbm_to_vmem [thread:$0]  %s671_s1, 6272, %s608_s12, [#allocation6], %s587_s0, %s587_s0, %s588_s3  }
  0x23   :  { %579 = dma.done.wait [#allocation3], 128  }
  0x24   :  { %580 = vsyncadd [#allocation3], 4294967168 }
  0x25   :  { %581 = dma.done.wait [#allocation6], 6272  }
  0x26   :  { %582 = vsyncadd [#allocation6], 4294961024  ;;  %v589_v0 = vmov 0.0   ;;  %vm590_vm0 = vmmov 0   ;;  %v591_v1 = vmov 0.0|0.0   ;;  %vm79_vm1 = vcmask 64512  }
  0x27   :  { %378 = vmatprep.subr.mxu0 %v589_v0  ;;  %380 = vmatprep.mubr.msk.f32.mxu0 %vm590_vm0, %v589_v0  ;;  %v39_v2 = vld [vmem:[#allocation5] sm:$0xff]  ;;  %v38_v3 = vld [vmem:[#allocation2] sm:$0xff]  ;;  %v41_v5 = vld [vmem:[#allocation5 + $0x88] sm:$0xff]  ;;  %v303_v62 = vlaneseq  ;;  %s592_s1 = smov [#allocation7]  }
  0x28   :  { %453 = vmatprep.subr.bf16.mxu1 %v591_v1  ;;  %415 = vmatprep.mubr.msk.f32.mxu1 %vm590_vm0, %v589_v0  ;;  %v40_v4 = vld [vmem:[#allocation5 + $0x80] sm:$0xff]  ;;  %v42_v6 = vld [vmem:[#allocation5 + $0x90] sm:$0xff]  ;;  %v43_v7 = vld [vmem:[#allocation5 + $0x98] sm:$0xff]  ;;  %s328_s6 = sshll.u32 %s592_s1, 4  ;;  %s329_s6 = int_to_ptr.vmem [resolvable:$true] %s328_s6 }
  0x29   :  { %379 = vmatpush3.msra.mxu0 %v39_v2  ;;  %v454_v8 = vpack.c.bf16 %v41_v5, %v40_v4  ;;  %v457_v9 = vpack.c.bf16 %v43_v7, %v42_v6  ;;  %v44_v10 = vld [vmem:[#allocation5 + $0xa0] sm:$0xff]  ;;  %v45_v11 = vld [vmem:[#allocation5 + $0xa8] sm:$0xff]  ;;  %v46_v13 = vld [vmem:[#allocation5 + $0xb0] sm:$0xff]  ;;  %v304_v63 = vand.u32 127, %v303_v62  ;;  %s557_s7 = scalar_lea.vmem %s329_s6, 128  ;;  %p562_p3 = scmp.lt.s32.totalorder %s329_s6, %s329_s6 }
  0x2a   :  { %381 = vmatmul.mubr.msk.f32.vlgmr.msra.gmra.mrb[0].mxu0 %vm79_vm1, %v38_v3  ;;  %477 = vmatprep.subr.bf16.mxu0 %v591_v1  ;;  %v460_v12 = vpack.c.bf16 %v45_v11, %v44_v10  ;;  %v47_v14 = vld [vmem:[#allocation5 + $0xb8] sm:$0xff]  ;;  %v48_v16 = vld [vmem:[#allocation5 + $0xc0] sm:$0xff]  ;;  %v49_v17 = vld [vmem:[#allocation5 + $0xc8] sm:$0xff]  ;;  %p558_p2 = scmp.ne.s32.totalorder %s329_s6, %s557_s7  ;;  %p563_p4 = scmp.lt.s32.totalorder %s557_s7, %s557_s7 }
  0x2b   :  { %450 = vmatprep.mubr.msk.f32.mxu0 %vm590_vm0, %v589_v0  ;;  %455 = vmatpush3.bf16.msra.mxu1 %v454_v8  ;;  %v463_v15 = vpack.c.bf16 %v47_v14, %v46_v13  ;;  %v466_v18 = vpack.c.bf16 %v49_v17, %v48_v16  ;;  %v50_v19 = vld [vmem:[#allocation5 + $0xd0] sm:$0xff]  ;;  %v51_v20 = vld [vmem:[#allocation5 + $0xd8] sm:$0xff]  ;;  %v52_v22 = vld [vmem:[#allocation5 + $0xe0] sm:$0xff]  ;;  %vm305_vm2 = vcmp.lt.s32.totalorder %v304_v63, 4  ;;  %vm319_vm3 = vcmp.eq.s32.totalorder %v304_v63, 4 }
  0x2c   :  { %456 = vmatprep.subr.bf16.mxu1 %v591_v1  ;;  %v469_v21 = vpack.c.bf16 %v51_v20, %v50_v19  ;;  %v53_v23 = vld [vmem:[#allocation5 + $0xe8] sm:$0xff]  ;;  %v54_v25 = vld [vmem:[#allocation5 + $0xf0] sm:$0xff]  ;;  %v55_v26 = vld [vmem:[#allocation5 + $0xf8] sm:$0xff]  ;;  %p564_p5 = por %p563_p4, %p562_p3 }
  0x2d   :  { %v472_v24 = vpack.c.bf16 %v53_v23, %v52_v22  ;;  %v475_v27 = vpack.c.bf16 %v55_v26, %v54_v25  ;;  %v56_v28 = vld [vmem:[#allocation5 + $0x100] sm:$0xff]  ;;  %v57_v29 = vld [vmem:[#allocation5 + $0x108] sm:$0xff]  ;;  %v58_v30 = vld [vmem:[#allocation5 + $0x110] sm:$0xff] }
  0x2e   :  { %v478_v31 = vpack.c.bf16 %v57_v29, %v56_v28  ;;  %v59_v32 = vld [vmem:[#allocation5 + $0x118] sm:$0xff]  ;;  %v60_v34 = vld [vmem:[#allocation5 + $0x120] sm:$0xff]  ;;  %v61_v35 = vld [vmem:[#allocation5 + $0x128] sm:$0xff]  ;;  %p565_p6 = pnand %p564_p5, %p558_p2 }
  0x2f   :  { %458 = vmatpush3.bf16.msra.mxu1 %v457_v9  ;;  %v481_v33 = vpack.c.bf16 %v59_v32, %v58_v30  ;;  %v484_v36 = vpack.c.bf16 %v61_v35, %v60_v34  ;;  %v62_v37 = vld [vmem:[#allocation5 + $0x130] sm:$0xff]  ;;  %v63_v38 = vld [vmem:[#allocation5 + $0x138] sm:$0xff]  ;;  %v64_v40 = vld [vmem:[#allocation5 + $0x140] sm:$0xff] }
  0x30   :  { %459 = vmatprep.subr.bf16.mxu1 %v591_v1  ;;  %479 = vmatpush3.bf16.msra.mxu0 %v478_v31  ;;  %v487_v39 = vpack.c.bf16 %v63_v38, %v62_v37  ;;  %v65_v41 = vld [vmem:[#allocation5 + $0x148] sm:$0xff]  ;;  %v66_v43 = vld [vmem:[#allocation5 + $0x150] sm:$0xff]  ;;  %v67_v44 = vld [vmem:[#allocation5 + $0x158] sm:$0xff] }
  0x31   :  { %480 = vmatprep.subr.bf16.mxu0 %v591_v1  ;;  %v490_v42 = vpack.c.bf16 %v65_v41, %v64_v40  ;;  %v493_v45 = vpack.c.bf16 %v67_v44, %v66_v43  ;;  %v68_v46 = vld [vmem:[#allocation5 + $0x160] sm:$0xff]  ;;  %v69_v47 = vld [vmem:[#allocation5 + $0x168] sm:$0xff]  ;;  %v70_v54 = vld [vmem:[#allocation5 + $0x170] sm:$0xff] }
  0x32   :  { %v496_v48 = vpack.c.bf16 %v69_v47, %v68_v46  ;;  %v338_v49 = vld [vmem:[#allocation5 + $0x180] ss:$0 sm:$0xff]  ;;  %v71_v55 = vld [vmem:[#allocation5 + $0x178] sm:$0xff]  ;;  %v340_v57 = vld [vmem:[#allocation5 + $0x181] ss:$0 sm:$0xff] }
  0x33   :  { %461 = vmatpush3.bf16.msra.mxu1 %v460_v12  ;;  %v499_v56 = vpack.c.bf16 %v71_v55, %v70_v54  ;;  %v341_v0 = vld [vmem:[#allocation5 + $0x182] ss:$0 sm:$0xff] }
  0x34   :  { %462 = vmatprep.subr.bf16.mxu1 %v591_v1  ;;  %482 = vmatpush3.bf16.msra.mxu0 %v481_v33 }
  0x35   :  { %483 = vmatprep.subr.bf16.mxu0 %v591_v1 }
  0x37   :  { %464 = vmatpush3.bf16.msra.mxu1 %v463_v15 }
  0x38   :  { %465 = vmatprep.subr.bf16.mxu1 %v591_v1  ;;  %485 = vmatpush3.bf16.msra.mxu0 %v484_v36 }
  0x39   :  { %486 = vmatprep.subr.bf16.mxu0 %v591_v1 }
  0x3b   :  { %467 = vmatpush3.bf16.msra.mxu1 %v466_v18 }
  0x3c   :  { %468 = vmatprep.subr.bf16.mxu1 %v591_v1  ;;  %488 = vmatpush3.bf16.msra.mxu0 %v487_v39 }
  0x3d   :  { %489 = vmatprep.subr.bf16.mxu0 %v591_v1 }
  0x3f   :  { %470 = vmatpush3.bf16.msra.mxu1 %v469_v21 }
  0x40   :  { %471 = vmatprep.subr.bf16.mxu1 %v591_v1  ;;  %491 = vmatpush3.bf16.msra.mxu0 %v490_v42 }
  0x41   :  { %492 = vmatprep.subr.bf16.mxu0 %v591_v1 }
  0x43   :  { %473 = vmatpush3.bf16.msra.mxu1 %v472_v24 }
  0x44   :  { %474 = vmatprep.subr.bf16.mxu1 %v591_v1  ;;  %494 = vmatpush3.bf16.msra.mxu0 %v493_v45 }
  0x45   :  { %495 = vmatprep.subr.bf16.mxu0 %v591_v1 }
  0x47   :  { %476 = vmatpush3.bf16.msra.mxu1 %v475_v27 }
  0x48   :  { %497 = vmatpush3.bf16.msra.mxu0 %v496_v48 }
  0x49   :  { %498 = vmatprep.subr.bf16.mxu0 %v591_v1 }
  0x4c   :  { %500 = vmatpush3.bf16.msra.mxu0 %v499_v56 }
  0xfd   :  { %v149_v50 = vpop.f32.mrb[0].mxu0 }
  0xfe   :  { %v150_v51 = vadd.f32 %v338_v49, %v149_v50  ;;  %v382_v52 = vpop.f32.mrb[1].mxu0 }
 0x100   :  { %v153_v53 = vmax.f32 %v150_v51, 0.0 }
 0x102   :  { %416 = vmatmul.mubr.f32.vlgmr.msra.gmra.mrb[0].mxu1 %v153_v53 }
 0x1d5   :  { %v224_v58 = vpop.f32.mrb[0].mxu1 }
 0x1d6   :  { %v225_v59 = vadd.f32 %v340_v57, %v224_v58  ;;  %v417_v60 = vpop.f32.mrb[1].mxu1 }
 0x1d8   :  { %v228_v61 = vmax.f32 %v225_v59, 0.0 }
 0x1da   :  { %451 = vmatmul.mubr.f32.vlgmr.msra.gmra.mrb[2].mxu0 %v228_v61 }
 0x2ad   :  { %v299_v1 = vpop.f32.mrb[2].mxu0 }
 0x2ae   :  { %v300_v2 = vadd.f32 %v341_v0, %v299_v1  ;;  %v452_v3 = vpop.f32.mrb[3].mxu0 }
 0x2b0   :  { %v306_v4 = vsel %vm305_vm2, %v300_v2, -inf }
 0x2b1   :  { %307 = vmax.xlane.f32.xlu0 %v306_v4 }
 0x33e   :  { %v308_v5 = vpop.xlane.xlu0 %307 }
 0x33f   :  { %v309_v6 = vsub.f32 %v306_v4, %v308_v5 }
 0x341   :  { %v310_v7 = vmul.f32 1.442695, %v309_v6 }
 0x343   :  { %509 = vpow2.f32 %v310_v7 }
 0x34d   :  { %v510_v8 = vpop.eup %509 }
 0x34e   :  { %312 = vadd.xlane.f32.xlu0 %v510_v8 }
 0x3db   :  { %v313_v9 = vpop.xlane.xlu0 %312 }
 0x3dc   :  { %511 = vrcp.f32 %v313_v9 }
 0x3e6   :  { %v512_v10 = vpop.eup %511 }
 0x3e7   :  { %v315_v11 = vmul.f32 %v512_v10, %v313_v9 }
 0x3e9   :  { %v316_v12 = vsub.f32 2.0, %v315_v11 }
 0x3eb   :  { %v317_v13 = vmul.f32 %v512_v10, %v316_v12 }
 0x3ed   :  { %v318_v14 = vmul.f32 %v510_v8, %v317_v13 }
 0x3ef   :  { %v320_v15 = vsel %vm319_vm3, %v300_v2, %v318_v14 }
 0x3f0   :  { %321 = vst [vmem:[#allocation7] sm:$0xff] %v320_v15 }
 0x3f1   :  { %568 = shalt.err (!%p565_p6)
}
 0x3f2   :  { %s569_s10 = scalar_lea.hbm %s672_s2, 128 }
 0x3f3   :  { %p570_p7 = scmp.ne.s32.totalorder %s672_s2, %s569_s10  ;;  %p573_p8 = scmp.lt.u32.totalorder %s569_s10, %s672_s2 }
 0x3f5   :  { %p575_p9 = pnand %p573_p8, %p570_p7 }
 0x3f7   :  { %578 = shalt.err (!%p575_p9)
}
 0x3f8   :  { %331 = dma.vmem_to_hbm [thread:$0]  %s329_s6, 128, %s672_s2, [#allocation4]  }
 0x3f9   :  { %583 = dma.done.wait [#allocation4], 128  }
 0x3fa   :  { %584 = vsyncadd [#allocation4], 4294967168 }
 0x3fb   :  { %335 = vsyncpa [#allocation3], 1 }
 0x3fc   :  { %336 = vsyncpa [#allocation6], 1 }
 0x3fd   :  { %337 = vsyncpa [#allocation4], 1 }

</bundles_post_ra>
